<compile_context>
chip_gen: v6e
topology: v6e:2x2x1
jax: 0.10.0
libtpu: 0.0.40
codegen_flags: <defaults>
</compile_context>

<pallas_src>
import jax
import jax.numpy as jnp
from jax.experimental import pallas as pl
from jax.experimental.pallas import tpu as pltpu
import numpy as np


def _affine_kernel(w_ref, b_ref, x_ref, o_ref):
    """y = x @ W.T + b, computed as a K-term VPU FMA (no MXU).

    w_ref: SMEM (N*K,) f32 -- PyTorch Linear weight (N, K), row-major flattened.
    b_ref: SMEM (N,)   f32 -- bias.
    x_ref: VMEM (TM, K)    -- tile of the batch.
    o_ref: VMEM (TM, N)    -- tile of the output.
    """
    N = o_ref.shape[-1]
    K = x_ref.shape[-1]

    # Rebuild the K rows of W.T (each (1, N)) and the bias row from SMEM
    # scalars via lane selects: pure VPU, no HBM->VMEM DMA for parameters.
    lane = jax.lax.broadcasted_iota(jnp.int32, (1, N), 1)

    wt_rows = []
    for k in range(K):
        row = jnp.zeros((1, N), jnp.float32)
        for n in range(N):
            row = jnp.where(lane == n, w_ref[n * K + k], row)
        wt_rows.append(row)

    brow = jnp.zeros((1, N), jnp.float32)
    for n in range(N):
        brow = jnp.where(lane == n, b_ref[n], brow)

    # 2-term FMA: acc[m, n] = b[n] + sum_k x[m, k] * W[n, k]
    acc = brow
    for k in range(K):
        acc = acc + x_ref[:, k:k + 1] * wt_rows[k]   # (TM,1)*(1,N) -> (TM,N) on VPU

    o_ref[...] = acc.astype(o_ref.dtype)


def mask_forward(noise, weight, bias, *, block_m=1024):
    """noise: (M, 2) f32, weight: (5, 2) f32, bias: (5,) f32 -> (M, 5) f32."""
    M, K = noise.shape
    N, K2 = weight.shape
    assert K == K2, "weight in_features must match noise feature dim"

    # Single full-array block for small M; 1024-row tiles (multiple of 8) if
    # the batch ever grows, restoring double-buffered DMA/compute overlap.
    TM = M if M <= block_m else block_m
    grid = (pl.cdiv(M, TM),)

    return pl.pallas_call(
        _affine_kernel,
        out_shape=jax.ShapeDtypeStruct((M, N), noise.dtype),
        grid=grid,
        in_specs=[
            # 15 parameters live in SMEM (flattened), read as scalars in-kernel.
            pl.BlockSpec(memory_space=pltpu.MemorySpace.SMEM),   # weight, (N*K,)
            pl.BlockSpec(memory_space=pltpu.MemorySpace.SMEM),   # bias,   (N,)
            pl.BlockSpec((TM, K), lambda i: (i, 0)),             # noise tile
        ],
        out_specs=pl.BlockSpec((TM, N), lambda i: (i, 0)),
        compiler_params=pltpu.CompilerParams(
            # Independent batch tiles: shards across v7x's 2 TCs, no-op on v5e/v6e.
            dimension_semantics=("parallel",),
        ),
    )(weight.reshape(-1), bias, noise)


if __name__ == "__main__":
    key = jax.random.PRNGKey(0)
    k_noise, k_w, k_b, k_conv = jax.random.split(key, 4)

    # Forward input: (batch=8, in_features=2), consistent with Linear(2, 5).
    noise = jax.random.normal(k_noise, (8, 2), dtype=jnp.float32)

    # Deterministic Linear(2, 5) parameters (PyTorch-style uniform bound 1/sqrt(fan_in)).
    bound = 1.0 / np.sqrt(2.0)
    weight = jax.random.uniform(k_w, (5, 2), minval=-bound, maxval=bound, dtype=jnp.float32)
    bias = jax.random.uniform(k_b, (5,), minval=-bound, maxval=bound, dtype=jnp.float32)

    # Conv2d(3, 5, 3) parameters exist in the module but are never used in forward.
    conv_weight = jax.random.normal(k_conv, (5, 3, 3, 3), dtype=jnp.float32)  # unused
    # TODO(synk): Conv2d(3,5,3) is declared in __init__ but never applied in forward; not lowered.

    out = mask_forward(noise, weight, bias)
    jax.block_until_ready(out)

    # Reference check in plain JAX.
    ref = noise @ weight.T + bias
    np.testing.assert_allclose(np.asarray(out), np.asarray(ref), rtol=1e-5, atol=1e-5)

    print("KERNEL_OK")
</pallas_src>

<mosaic_0001>
module attributes {stable_mosaic.version = 11 : i64} {
  func.func @_affine_kernel(%arg0: i32, %arg1: memref<10xf32, #tpu.memory_space<smem>>, %arg2: memref<5xf32, #tpu.memory_space<smem>>, %arg3: memref<8x2xf32, #tpu.memory_space<vmem>>, %arg4: memref<8x5xf32, #tpu.memory_space<vmem>>) attributes {dimension_semantics = [#tpu.dimension_semantics<parallel>], iteration_bounds = array<i64: 1>, scalar_prefetch = 0 : i64, scratch_operands = 0 : i64, tpu.core_type = #tpu.core_type<tc>, window_params = [{transform_indices = @transform_0, window_bounds = array<i64: 10>}, {transform_indices = @transform_1, window_bounds = array<i64: 5>}, {transform_indices = @transform_2, window_bounds = array<i64: 8, 2>}, {transform_indices = @transform_3, window_bounds = array<i64: 8, 5>}]} {
    %0 = tpu.iota {dimensions = array<i32: 1>} : vector<1x5xi32>
    %cst = arith.constant 0.000000e+00 : f32
    %1 = vector.broadcast %cst : f32 to vector<1x5xf32>
    %c0_i32 = arith.constant 0 : i32
    %2 = vector.broadcast %c0_i32 : i32 to vector<1x5xi32>
    %3 = arith.cmpi eq, %0, %2 : vector<1x5xi32>
    %c0 = arith.constant 0 : index
    %4 = memref.load %arg1[%c0] : memref<10xf32, #tpu.memory_space<smem>>
    %5 = vector.broadcast %4 : f32 to vector<1x5xf32>
    %6 = arith.select %3, %5, %1 : vector<1x5xi1>, vector<1x5xf32>
    %c1_i32 = arith.constant 1 : i32
    %7 = vector.broadcast %c1_i32 : i32 to vector<1x5xi32>
    %8 = arith.cmpi eq, %0, %7 : vector<1x5xi32>
    %c2 = arith.constant 2 : index
    %9 = memref.load %arg1[%c2] : memref<10xf32, #tpu.memory_space<smem>>
    %10 = vector.broadcast %9 : f32 to vector<1x5xf32>
    %11 = arith.select %8, %10, %6 : vector<1x5xi1>, vector<1x5xf32>
    %c2_i32 = arith.constant 2 : i32
    %12 = vector.broadcast %c2_i32 : i32 to vector<1x5xi32>
    %13 = arith.cmpi eq, %0, %12 : vector<1x5xi32>
    %c4 = arith.constant 4 : index
    %14 = memref.load %arg1[%c4] : memref<10xf32, #tpu.memory_space<smem>>
    %15 = vector.broadcast %14 : f32 to vector<1x5xf32>
    %16 = arith.select %13, %15, %11 : vector<1x5xi1>, vector<1x5xf32>
    %c3_i32 = arith.constant 3 : i32
    %17 = vector.broadcast %c3_i32 : i32 to vector<1x5xi32>
    %18 = arith.cmpi eq, %0, %17 : vector<1x5xi32>
    %c6 = arith.constant 6 : index
    %19 = memref.load %arg1[%c6] : memref<10xf32, #tpu.memory_space<smem>>
    %20 = vector.broadcast %19 : f32 to vector<1x5xf32>
    %21 = arith.select %18, %20, %16 : vector<1x5xi1>, vector<1x5xf32>
    %c4_i32 = arith.constant 4 : i32
    %22 = vector.broadcast %c4_i32 : i32 to vector<1x5xi32>
    %23 = arith.cmpi eq, %0, %22 : vector<1x5xi32>
    %c8 = arith.constant 8 : index
    %24 = memref.load %arg1[%c8] : memref<10xf32, #tpu.memory_space<smem>>
    %25 = vector.broadcast %24 : f32 to vector<1x5xf32>
    %26 = arith.select %23, %25, %21 : vector<1x5xi1>, vector<1x5xf32>
    %cst_0 = arith.constant 0.000000e+00 : f32
    %27 = vector.broadcast %cst_0 : f32 to vector<1x5xf32>
    %c0_i32_1 = arith.constant 0 : i32
    %28 = vector.broadcast %c0_i32_1 : i32 to vector<1x5xi32>
    %29 = arith.cmpi eq, %0, %28 : vector<1x5xi32>
    %c1 = arith.constant 1 : index
    %30 = memref.load %arg1[%c1] : memref<10xf32, #tpu.memory_space<smem>>
    %31 = vector.broadcast %30 : f32 to vector<1x5xf32>
    %32 = arith.select %29, %31, %27 : vector<1x5xi1>, vector<1x5xf32>
    %c1_i32_2 = arith.constant 1 : i32
    %33 = vector.broadcast %c1_i32_2 : i32 to vector<1x5xi32>
    %34 = arith.cmpi eq, %0, %33 : vector<1x5xi32>
    %c3 = arith.constant 3 : index
    %35 = memref.load %arg1[%c3] : memref<10xf32, #tpu.memory_space<smem>>
    %36 = vector.broadcast %35 : f32 to vector<1x5xf32>
    %37 = arith.select %34, %36, %32 : vector<1x5xi1>, vector<1x5xf32>
    %c2_i32_3 = arith.constant 2 : i32
    %38 = vector.broadcast %c2_i32_3 : i32 to vector<1x5xi32>
    %39 = arith.cmpi eq, %0, %38 : vector<1x5xi32>
    %c5 = arith.constant 5 : index
    %40 = memref.load %arg1[%c5] : memref<10xf32, #tpu.memory_space<smem>>
    %41 = vector.broadcast %40 : f32 to vector<1x5xf32>
    %42 = arith.select %39, %41, %37 : vector<1x5xi1>, vector<1x5xf32>
    %c3_i32_4 = arith.constant 3 : i32
    %43 = vector.broadcast %c3_i32_4 : i32 to vector<1x5xi32>
    %44 = arith.cmpi eq, %0, %43 : vector<1x5xi32>
    %c7 = arith.constant 7 : index
    %45 = memref.load %arg1[%c7] : memref<10xf32, #tpu.memory_space<smem>>
    %46 = vector.broadcast %45 : f32 to vector<1x5xf32>
    %47 = arith.select %44, %46, %42 : vector<1x5xi1>, vector<1x5xf32>
    %c4_i32_5 = arith.constant 4 : i32
    %48 = vector.broadcast %c4_i32_5 : i32 to vector<1x5xi32>
    %49 = arith.cmpi eq, %0, %48 : vector<1x5xi32>
    %c9 = arith.constant 9 : index
    %50 = memref.load %arg1[%c9] : memref<10xf32, #tpu.memory_space<smem>>
    %51 = vector.broadcast %50 : f32 to vector<1x5xf32>
    %52 = arith.select %49, %51, %47 : vector<1x5xi1>, vector<1x5xf32>
    %cst_6 = arith.constant 0.000000e+00 : f32
    %53 = vector.broadcast %cst_6 : f32 to vector<1x5xf32>
    %c0_i32_7 = arith.constant 0 : i32
    %54 = vector.broadcast %c0_i32_7 : i32 to vector<1x5xi32>
    %55 = arith.cmpi eq, %0, %54 : vector<1x5xi32>
    %c0_8 = arith.constant 0 : index
    %56 = memref.load %arg2[%c0_8] : memref<5xf32, #tpu.memory_space<smem>>
    %57 = vector.broadcast %56 : f32 to vector<1x5xf32>
    %58 = arith.select %55, %57, %53 : vector<1x5xi1>, vector<1x5xf32>
    %c1_i32_9 = arith.constant 1 : i32
    %59 = vector.broadcast %c1_i32_9 : i32 to vector<1x5xi32>
    %60 = arith.cmpi eq, %0, %59 : vector<1x5xi32>
    %c1_10 = arith.constant 1 : index
    %61 = memref.load %arg2[%c1_10] : memref<5xf32, #tpu.memory_space<smem>>
    %62 = vector.broadcast %61 : f32 to vector<1x5xf32>
    %63 = arith.select %60, %62, %58 : vector<1x5xi1>, vector<1x5xf32>
    %c2_i32_11 = arith.constant 2 : i32
    %64 = vector.broadcast %c2_i32_11 : i32 to vector<1x5xi32>
    %65 = arith.cmpi eq, %0, %64 : vector<1x5xi32>
    %c2_12 = arith.constant 2 : index
    %66 = memref.load %arg2[%c2_12] : memref<5xf32, #tpu.memory_space<smem>>
    %67 = vector.broadcast %66 : f32 to vector<1x5xf32>
    %68 = arith.select %65, %67, %63 : vector<1x5xi1>, vector<1x5xf32>
    %c3_i32_13 = arith.constant 3 : i32
    %69 = vector.broadcast %c3_i32_13 : i32 to vector<1x5xi32>
    %70 = arith.cmpi eq, %0, %69 : vector<1x5xi32>
    %c3_14 = arith.constant 3 : index
    %71 = memref.load %arg2[%c3_14] : memref<5xf32, #tpu.memory_space<smem>>
    %72 = vector.broadcast %71 : f32 to vector<1x5xf32>
    %73 = arith.select %70, %72, %68 : vector<1x5xi1>, vector<1x5xf32>
    %c4_i32_15 = arith.constant 4 : i32
    %74 = vector.broadcast %c4_i32_15 : i32 to vector<1x5xi32>
    %75 = arith.cmpi eq, %0, %74 : vector<1x5xi32>
    %c4_16 = arith.constant 4 : index
    %76 = memref.load %arg2[%c4_16] : memref<5xf32, #tpu.memory_space<smem>>
    %77 = vector.broadcast %76 : f32 to vector<1x5xf32>
    %78 = arith.select %75, %77, %73 : vector<1x5xi1>, vector<1x5xf32>
    %c0_17 = arith.constant 0 : index
    %c0_18 = arith.constant 0 : index
    %79 = vector.load %arg3[%c0_17, %c0_18] : memref<8x2xf32, #tpu.memory_space<vmem>>, vector<8x1xf32>
    %80 = vector.broadcast %79 : vector<8x1xf32> to vector<8x5xf32>
    %81 = vector.broadcast %26 : vector<1x5xf32> to vector<8x5xf32>
    %82 = arith.mulf %80, %81 : vector<8x5xf32>
    %83 = vector.broadcast %78 : vector<1x5xf32> to vector<8x5xf32>
    %84 = arith.addf %83, %82 : vector<8x5xf32>
    %c0_19 = arith.constant 0 : index
    %c1_20 = arith.constant 1 : index
    %85 = vector.load %arg3[%c0_19, %c1_20] : memref<8x2xf32, #tpu.memory_space<vmem>>, vector<8x1xf32>
    %86 = vector.broadcast %85 : vector<8x1xf32> to vector<8x5xf32>
    %87 = vector.broadcast %52 : vector<1x5xf32> to vector<8x5xf32>
    %88 = arith.mulf %86, %87 : vector<8x5xf32>
    %89 = arith.addf %84, %88 : vector<8x5xf32>
    %c0_21 = arith.constant 0 : index
    %c0_22 = arith.constant 0 : index
    %90 = vector.load %arg4[%c0_21, %c0_22] : memref<8x5xf32, #tpu.memory_space<vmem>>, vector<8x5xf32>
    tpu.vector_store %arg4[%c0_21, %c0_22], %89 {strides = array<i32>} : memref<8x5xf32, #tpu.memory_space<vmem>>, vector<8x5xf32>,
    return
  }
  func.func @transform_0(%arg0: i32) -> i32 {
    %c0_i32 = arith.constant 0 : i32
    %c0_i32_0 = arith.constant 0 : i32
    return %c0_i32 : i32
  }
  func.func @transform_1(%arg0: i32) -> i32 {
    %c0_i32 = arith.constant 0 : i32
    %c0_i32_0 = arith.constant 0 : i32
    return %c0_i32 : i32
  }
  func.func @transform_2(%arg0: i32) -> (i32, i32) {
    %c0_i32 = arith.constant 0 : i32
    %c0_i32_0 = arith.constant 0 : i32
    return %arg0, %c0_i32 : i32, i32
  }
  func.func @transform_3(%arg0: i32) -> (i32, i32) {
    %c0_i32 = arith.constant 0 : i32
    %c0_i32_0 = arith.constant 0 : i32
    return %arg0, %c0_i32 : i32, i32
  }
}

</mosaic_0001>

<bundles_post_ra>
// kernel: tpu_custom_call.1
= control target key start
LH: loop header
LB: loop body
LE: loop exit
PB: predicated region body
PF: predicated region fallthrough
CT: control target
= control target key end

     0   :  { %8 = vsyncpa [#allocation4], 0  ;;  %s246_s0 = inlined_call_operand.vmem [shape: f32[10], index: 0, kind: input, shape index: {}]   ;;  %s247_s1 = inlined_call_operand.vmem [shape: f32[5], index: 1, kind: input, shape index: {}]   ;;  %s248_s2 = inlined_call_operand.vmem [shape: f32[8,2], index: 2, kind: input, shape index: {}]   ;;  %s249_s3 = inlined_call_operand.hbm [shape: f32[8,5], index: 3, kind: output, shape index: {}]  }
   0x1   :  { %9 = vsyncpa [#allocation6], 0 }
   0x2   :  { %10 = vsyncpa [#allocation3], 0  ;;  %s17_s14 = sshll.u32 %s246_s0, 4  ;;  %s27_s17 = sshll.u32 %s247_s1, 4  ;;  %s18_s14 = int_to_ptr.vmem [resolvable:$true] %s17_s14  ;;  %s28_s17 = int_to_ptr.vmem [resolvable:$true] %s27_s17 }
   0x3   :  { %s144_s18 = scalar_lea.vmem %s18_s14, 16  ;;  %p149_p1 = scmp.lt.s32.totalorder %s18_s14, %s18_s14 }
   0x4   :  { %p145_p0 = scmp.ne.s32.totalorder %s18_s14, %s144_s18  ;;  %p150_p2 = scmp.lt.s32.totalorder %s144_s18, %s144_s18 }
   0x6   :  { %p151_p3 = por %p150_p2, %p149_p1 }
   0x8   :  { %p152_p4 = pnand %p151_p3, %p145_p0 }
   0xa   :  { %155 = shalt.err (!%p152_p4)
}
   0xb   :  { %s194_s19 = smov [#allocation2]   ;;  %s156_s20 = scalar_lea.vmem %s28_s17, 16 }
   0xc   :  { %20 = dma.vmem_to_smem %s18_s14, 16, %s194_s19, [#allocation4]  }
   0xd   :  { %p157_p5 = scmp.ne.s32.totalorder %s28_s17, %s156_s20  ;;  %p161_p6 = scmp.lt.s32.totalorder %s28_s17, %s28_s17 }
   0xe   :  { %p162_p7 = scmp.lt.s32.totalorder %s156_s20, %s156_s20 }
  0x10   :  { %p163_p8 = por %p162_p7, %p161_p6 }
  0x12   :  { %p164_p9 = pnand %p163_p8, %p157_p5 }
  0x14   :  { %167 = shalt.err (!%p164_p9)
}
  0x15   :  { %s195_s0 = smov [#allocation5]  }
  0x16   :  { %30 = dma.vmem_to_smem %s28_s17, 16, %s195_s0, [#allocation6]  }
  0x17   :  { %188 = dma.done.wait [#allocation4], 16  }
  0x18   :  { %189 = vsyncadd [#allocation4], 4294967280 }
  0x19   :  { %190 = dma.done.wait [#allocation6], 16  }
  0x1a   :  { %191 = vsyncadd [#allocation6], 4294967280 }
  0x1b   :  { %39 = sfence }
  0x1c   :  { %v92_v0 = vld [vmem:[%s248_s2] sm:$0xff]  ;;  %v196_v1 = vmov 0   ;;  %v197_v2 = vmov 1   ;;  %v40_v3 = vlaneseq  ;;  %s43_s22 = sld [smem:[#allocation2]]  ;;  %s198_s9 = smov [#allocation7]   ;;  %vm106_vm5 = vcmask 39936  }
  0x1d   :  { %142 = vset.pattern.permute.xlu0 %v196_v1  ;;  %s124_s23 = sld [smem:[#allocation2 + $0x2]]  ;;  %s114_s10 = sshll.u32 %s198_s9, 4  ;;  %s115_s10 = int_to_ptr.vmem [resolvable:$true] %s114_s10 }
  0x1e   :  { %95 = vperm.xlu0 %142, %v92_v0   ;;  %s77_s24 = sld [smem:[#allocation5]]  ;;  %v41_v4 = vand.u32 127, %v40_v3  ;;  %s168_s11 = scalar_lea.vmem %s115_s10, 128 }
  0x1f   :  { %s128_s25 = sld [smem:[#allocation2 + $0x1]]  ;;  %p169_p10 = scmp.ne.s32.totalorder %s115_s10, %s168_s11 }
  0x20   :  { %s125_s26 = sld [smem:[#allocation2 + $0x4]]  ;;  %vm42_vm0 = vcmp.eq.s32.totalorder %v41_v4, 0  ;;  %vm46_vm1 = vcmp.eq.s32.totalorder %v41_v4, 1  ;;  %vm50_vm2 = vcmp.eq.s32.totalorder %v41_v4, 2  ;;  %vm54_vm3 = vcmp.eq.s32.totalorder %v41_v4, 3  ;;  %p173_p11 = scmp.lt.s32.totalorder %s115_s10, %s115_s10 }
  0x21   :  { %s133_s27 = sld [smem:[#allocation5 + $0x1]]  ;;  %vm58_vm4 = vcmp.eq.s32.totalorder %v41_v4, 4  ;;  %p174_p12 = scmp.lt.s32.totalorder %s168_s11, %s168_s11 }
  0x22   :  { %143 = vset.pattern.permute.xlu0 %v197_v2  ;;  %s129_s28 = sld [smem:[#allocation2 + $0x3]]  ;;  %v44_v5 = vstv %s43_s22 }
  0x23   :  { %101 = vperm.xlu0 %143, %v92_v0   ;;  %s126_s29 = sld [smem:[#allocation2 + $0x6]]  ;;  %v45_v6 = vsel %vm42_vm0, %v44_v5, 0.0  ;;  %v48_v7 = vstv %s124_s23  ;;  %p175_p13 = por %p174_p12, %p173_p11 }
  0x24   :  { %s134_s30 = sld [smem:[#allocation5 + $0x2]]  ;;  %v78_v8 = vstv %s77_s24  ;;  %v49_v10 = vsel %vm46_vm1, %v48_v7, %v45_v6 }
  0x25   :  { %s228_s2 = sld [smem:[#allocation2 + $0x5]]  ;;  %v63_v9 = vstv %s128_s25  ;;  %v79_v12 = vsel %vm42_vm0, %v78_v8, 0.0  ;;  %p176_p0 = pnand %p175_p13, %p169_p10 }
  0x26   :  { %s127_s4 = sld [smem:[#allocation2 + $0x8]]  ;;  %v52_v11 = vstv %s125_s26  ;;  %v64_v14 = vsel %vm42_vm0, %v63_v9, 0.0 }
  0x27   :  { %s135_s5 = sld [smem:[#allocation5 + $0x3]]  ;;  %v81_v13 = vstv %s133_s27  ;;  %v53_v16 = vsel %vm50_vm2, %v52_v11, %v49_v10 }
  0x28   :  { %s131_s6 = sld [smem:[#allocation2 + $0x7]]  ;;  %v66_v15 = vstv %s129_s28  ;;  %v82_v18 = vsel %vm46_vm1, %v81_v13, %v79_v12 }
  0x29   :  { %s136_s7 = sld [smem:[#allocation5 + $0x4]]  ;;  %v56_v17 = vstv %s126_s29  ;;  %v67_v20 = vsel %vm46_vm1, %v66_v15, %v64_v14 }
  0x2a   :  { %s132_s8 = sld [smem:[#allocation2 + $0x9]]  ;;  %v84_v19 = vstv %s134_s30  ;;  %v57_v22 = vsel %vm54_vm3, %v56_v17, %v53_v16 }
  0x2b   :  { %v69_v21 = vstv %s228_s2  ;;  %v85_v24 = vsel %vm50_vm2, %v84_v19, %v82_v18 }
  0x2c   :  { %v60_v23 = vstv %s127_s4  ;;  %v70_v26 = vsel %vm50_vm2, %v69_v21, %v67_v20 }
  0x2d   :  { %v87_v25 = vstv %s135_s5  ;;  %v61_v28 = vsel %vm58_vm4, %v60_v23, %v57_v22 }
  0x2e   :  { %v72_v27 = vstv %s131_s6  ;;  %v88_v30 = vsel %vm54_vm3, %v87_v25, %v85_v24 }
  0x2f   :  { %v90_v31 = vstv %s136_s7  ;;  %v73_v32 = vsel %vm54_vm3, %v72_v27, %v70_v26 }
  0x30   :  { %v75_v33 = vstv %s132_s8  ;;  %v91_v35 = vsel %vm58_vm4, %v90_v31, %v88_v30 }
  0x31   :  { %v76_v36 = vsel %vm58_vm4, %v75_v33, %v73_v32 }
  0x99   :  { %v96_v29 = vpop.permute.xlu0 %95 }
  0x9a   :  { %v98_v34 = vmul.f32 %v96_v29, %v61_v28 }
  0x9c   :  { %v99_v38 = vadd.f32 %v98_v34, %v91_v35 }
  0x9e   :  { %v102_v37 = vpop.permute.xlu0 %101 }
  0x9f   :  { %v104_v39 = vmul.f32 %v102_v37, %v76_v36 }
  0xa1   :  { %v105_v40 = vadd.f32 %v104_v39, %v99_v38 }
  0xa3   :  { %107 = vst.msk [vmem:[#allocation7] sm:$0xff] %vm106_vm5, %v105_v40 }
  0xa4   :  { %179 = shalt.err (!%p176_p0)
}
  0xa5   :  { %117 = dma.vmem_to_hbm [thread:$0]  %s115_s10, 128, %s249_s3, [#allocation3]  }
  0xa6   :  { %192 = dma.done.wait [#allocation3], 128  }
  0xa7   :  { %193 = vsyncadd [#allocation3], 4294967168 }
  0xa8   :  { %121 = vsyncpa [#allocation3], 1 }
  0xa9   :  { %122 = vsyncpa [#allocation4], 1 }
  0xaa   :  { %123 = vsyncpa [#allocation6], 1 }

</bundles_post_ra>
